<compile_context>
chip_gen: v6e
topology: v6e:2x2x1
jax: 0.10.0
libtpu: 0.0.40
codegen_flags: <defaults>
</compile_context>

<pallas_src>
import functools
import math

import jax
import jax.numpy as jnp
from jax.experimental import pallas as pl
from jax.experimental.pallas import tpu as pltpu


# ----------------------------------------------------------------------------
# Tiled linear projection kernel:  (M, K) @ (K, N) -> (M, N)
# ----------------------------------------------------------------------------
def _matmul_kernel(x_ref, w_ref, o_ref, acc_ref):
    @pl.when(pl.program_id(2) == 0)
    def _init():
        acc_ref[...] = jnp.zeros_like(acc_ref)

    acc_ref[...] += jnp.dot(x_ref[...], w_ref[...],
                            preferred_element_type=jnp.float32)

    @pl.when(pl.program_id(2) == pl.num_programs(2) - 1)
    def _finalize():
        o_ref[...] = acc_ref[...].astype(o_ref.dtype)


def _pick_tile(dim, target, align):
    """Largest `align`-aligned divisor of `dim` that is <= target, else the full dim."""
    if dim <= target:
        return dim
    t = (target // align) * align
    while t >= align:
        if dim % t == 0:
            return t
        t -= align
    return dim


def linear(x2d, w, *, tm=256, tn=256, tk=512):
    """x2d: (M, K), w: (K, N) -> (M, N), K-accumulated on a VMEM f32 scratch."""
    M, K = x2d.shape
    K2, N = w.shape
    assert K == K2
    bm = _pick_tile(M, tm, 8)      # second-minor dims: 8-aligned
    bn = _pick_tile(N, tn, 128)    # lane dims: 128-aligned
    bk = _pick_tile(K, tk, 128)    # appears as lane dim of x and sublane dim of w
    grid = (M // bm, N // bn, K // bk)
    return pl.pallas_call(
        _matmul_kernel,
        out_shape=jax.ShapeDtypeStruct((M, N), x2d.dtype),
        grid_spec=pltpu.PrefetchScalarGridSpec(
            num_scalar_prefetch=0,
            grid=grid,
            in_specs=[
                pl.BlockSpec((bm, bk), lambda i, j, k: (i, k)),
                pl.BlockSpec((bk, bn), lambda i, j, k: (k, j)),
            ],
            out_specs=pl.BlockSpec((bm, bn), lambda i, j, k: (i, j)),
            scratch_shapes=[pltpu.VMEM((bm, bn), jnp.float32)],
        ),
        compiler_params=pltpu.CompilerParams(
            dimension_semantics=("parallel", "parallel", "arbitrary"),
            vmem_limit_bytes=32 * 1024 * 1024,
        ),
    )(x2d, w)


# ----------------------------------------------------------------------------
# Attention-with-RPR kernel: one grid step per batch element, all heads at once.
#   q/k/v blocks   : (num_heads, T, d)
#   pos_k/pos_v    : (Tq, Tk, d)  (shared across batch & heads)
#   valid_lens     : (B,) int32 in SMEM (scalar prefetch)
# ----------------------------------------------------------------------------
def _attn_rpr_kernel(vl_ref, q_ref, k_ref, v_ref, pk_ref, pv_ref, o_ref, *, head_dim):
    b = pl.program_id(0)
    vl = vl_ref[b]                       # scalar valid length for this batch element

    q = q_ref[...]                       # (H, Tq, d)
    k = k_ref[...]                       # (H, Tk, d)
    v = v_ref[...]                       # (H, Tk, d)
    pos_k = pk_ref[...]                  # (Tq, Tk, d)
    pos_v = pv_ref[...]                  # (Tq, Tk, d)

    # Content scores: head-batched MXU matmul; transposed contraction expressed
    # via einsum (no explicit k.T materialization).
    scores = jnp.einsum("hqd,hkd->hqk", q, k,
                        preferred_element_type=jnp.float32)

    # RPR key term: scores_pos[h,q,k] = sum_d q[h,q,d] * pos_k[q,k,d].
    # Its batch axis is the query position, which conflicts with the head-batched
    # MXU layout, so evaluate it as a VPU broadcast-multiply-reduce (robust to
    # lower, fine for short sequences).
    # TODO(synk): for long sequences reformulate via the (2*clip+1)-entry table so
    # this runs on the MXU inside a flash-style KV-tiled loop.
    scores_pos = jnp.sum(q[:, :, None, :] * pos_k[None, :, :, :], axis=-1)

    scores = (scores + scores_pos) * (1.0 / math.sqrt(head_dim))

    # Masked softmax over the key axis (same -1e6 fill value as the PyTorch module).
    col = jax.lax.broadcasted_iota(jnp.int32, scores.shape, 2)
    scores = jnp.where(col < vl, scores, jnp.float32(-1000000.0))

    m = jnp.max(scores, axis=-1, keepdims=True)
    p = jnp.exp(scores - m)
    denom = jnp.sum(p, axis=-1, keepdims=True)
    attn = p * pl.reciprocal(denom, approx=True)       # EUP vrcp (free slot)

    # Content output: head-batched MXU matmul.
    out = jnp.einsum("hqk,hkd->hqd", attn.astype(v.dtype), v,
                     preferred_element_type=jnp.float32)
    # RPR value term: out_pos[h,q,d] = sum_k attn[h,q,k] * pos_v[q,k,d].
    out_pos = jnp.sum(attn[:, :, :, None] * pos_v[None, :, :, :], axis=2)

    o_ref[...] = (out + out_pos).astype(o_ref.dtype)


def dot_product_attention_rpr(q, k, v, pos_k, pos_v, valid_lens, num_heads):
    # q: (B*H, Tq, d); k, v: (B*H, Tk, d); pos_k/pos_v: (Tq, Tk, d); valid_lens: (B,)
    BH, Tq, d = q.shape
    _, Tk, _ = k.shape
    B = BH // num_heads

    kernel = functools.partial(_attn_rpr_kernel, head_dim=d)
    return pl.pallas_call(
        kernel,
        out_shape=jax.ShapeDtypeStruct((BH, Tq, d), q.dtype),
        grid_spec=pltpu.PrefetchScalarGridSpec(
            num_scalar_prefetch=1,                       # valid_lens -> SMEM
            grid=(B,),                                   # all heads of one batch / step
            in_specs=[
                pl.BlockSpec((num_heads, Tq, d), lambda b, vl: (b, 0, 0)),
                pl.BlockSpec((num_heads, Tk, d), lambda b, vl: (b, 0, 0)),
                pl.BlockSpec((num_heads, Tk, d), lambda b, vl: (b, 0, 0)),
                pl.BlockSpec((Tq, Tk, d), lambda b, vl: (0, 0, 0)),
                pl.BlockSpec((Tq, Tk, d), lambda b, vl: (0, 0, 0)),
            ],
            out_specs=pl.BlockSpec((num_heads, Tq, d), lambda b, vl: (b, 0, 0)),
        ),
        compiler_params=pltpu.CompilerParams(
            dimension_semantics=("parallel",),           # data-parallel batch axis
            vmem_limit_bytes=32 * 1024 * 1024,
        ),
    )(valid_lens, q, k, v, pos_k, pos_v)


# ----------------------------------------------------------------------------
# reshape/permute glue + relative-position table lookup (XLA; not kernel work)
# ----------------------------------------------------------------------------
def transpose_qkv(x, num_heads):
    B, T, H = x.shape
    x = x.reshape(B, T, num_heads, H // num_heads)
    x = jnp.transpose(x, (0, 2, 1, 3))
    return x.reshape(B * num_heads, T, H // num_heads)


def transpose_output(x, num_heads):
    BH, T, d = x.shape
    x = x.reshape(BH // num_heads, num_heads, T, d)
    x = jnp.transpose(x, (0, 2, 1, 3))
    return x.reshape(BH // num_heads, T, num_heads * d)


def _relative_position_tables(rel_k, rel_v, Tq, Tk, clipping_distance):
    dist = jnp.arange(Tk)[None, :] - jnp.arange(Tq)[:, None]
    idx = jnp.clip(dist, -clipping_distance, clipping_distance) + clipping_distance
    return rel_k[idx], rel_v[idx]                        # (Tq, Tk, d) each


# ----------------------------------------------------------------------------
# MultiHeadAttentionWithRPR forward
# ----------------------------------------------------------------------------
def multi_head_attention_rpr(params, queries, keys, values, valid_lens, *,
                             num_heads, clipping_distance):
    B, Tq, _ = queries.shape
    _, Tk, _ = keys.shape
    H = params["W_q"].shape[1]

    # ---- Q/K/V projections -------------------------------------------------
    if (queries is keys and keys is values
            and params["W_q"].shape[0] == params["W_k"].shape[0] == params["W_v"].shape[0]):
        # Self-attention: one fused GEMM with W_q|W_k|W_v concatenated on the
        # output dim (one pallas_call, one read of the activations).
        w_qkv = jnp.concatenate([params["W_q"], params["W_k"], params["W_v"]], axis=1)
        qkv = linear(queries.reshape(B * Tq, -1), w_qkv).reshape(B, Tq, 3 * H)
        q_proj, k_proj, v_proj = qkv[..., :H], qkv[..., H:2 * H], qkv[..., 2 * H:]
    else:
        q_proj = linear(queries.reshape(B * Tq, -1), params["W_q"]).reshape(B, Tq, H)
        k_proj = linear(keys.reshape(B * Tk, -1), params["W_k"]).reshape(B, Tk, H)
        v_proj = linear(values.reshape(B * Tk, -1), params["W_v"]).reshape(B, Tk, H)

    q = transpose_qkv(q_proj, num_heads)                 # (B*H, Tq, d)
    k = transpose_qkv(k_proj, num_heads)
    v = transpose_qkv(v_proj, num_heads)

    pos_k, pos_v = _relative_position_tables(params["rel_k"], params["rel_v"],
                                             Tq, Tk, clipping_distance)

    # TODO(synk): only None / 1-D (per-batch) valid_lens supported; the 2-D
    # per-query variant of masked_softmax is not handled.
    if valid_lens is None:
        vl = jnp.full((B,), Tk, dtype=jnp.int32)
    else:
        vl = valid_lens.astype(jnp.int32)

    out = dot_product_attention_rpr(q, k, v, pos_k, pos_v, vl, num_heads)
    out_concat = transpose_output(out, num_heads)        # (B, Tq, H)

    return linear(out_concat.reshape(B * Tq, H), params["W_o"]).reshape(B, Tq, H)


# ----------------------------------------------------------------------------
# Pure-JAX reference mirroring the PyTorch module (for the correctness check)
# ----------------------------------------------------------------------------
def reference_mha_rpr(params, queries, keys, values, valid_lens, *,
                      num_heads, clipping_distance):
    q = transpose_qkv(queries @ params["W_q"], num_heads)
    k = transpose_qkv(keys @ params["W_k"], num_heads)
    v = transpose_qkv(values @ params["W_v"], num_heads)
    Tq, Tk, d = q.shape[1], k.shape[1], q.shape[-1]

    pos_k, pos_v = _relative_position_tables(params["rel_k"], params["rel_v"],
                                             Tq, Tk, clipping_distance)

    scores = jnp.einsum("bqd,bkd->bqk", q, k)
    scores_pos = jnp.einsum("bqd,qkd->bqk", q, pos_k)
    scores = (scores + scores_pos) / math.sqrt(d)

    if valid_lens is not None:
        vl = jnp.repeat(valid_lens, num_heads, axis=0)
        col = jnp.arange(Tk)[None, None, :]
        scores = jnp.where(col < vl[:, None, None], scores, -1000000.0)

    attn = jax.nn.softmax(scores, axis=-1)
    out = jnp.einsum("bqk,bkd->bqd", attn, v)
    out_pos = jnp.einsum("bqk,qkd->bqd", attn, pos_v)
    out_concat = transpose_output(out + out_pos, num_heads)
    return out_concat @ params["W_o"]


# ----------------------------------------------------------------------------
if __name__ == "__main__":
    batch = 2
    seq = 8
    key_size = query_size = value_size = 32
    num_hiddens = 32
    num_heads = 4
    clipping_distance = 4
    head_dim = num_hiddens // num_heads

    key = jax.random.PRNGKey(0)
    k0, k1, k2, k3, k4, k5, k6 = jax.random.split(key, 7)

    # deterministic parameter init (nn.Linear bias=False; weights stored (in, out))
    def init_w(k, fan_in, fan_out):
        bound = 1.0 / math.sqrt(fan_in)
        return jax.random.uniform(k, (fan_in, fan_out), jnp.float32,
                                  minval=-bound, maxval=bound)

    params = {
        "W_q": init_w(k0, query_size, num_hiddens),
        "W_k": init_w(k1, key_size, num_hiddens),
        "W_v": init_w(k2, value_size, num_hiddens),
        "W_o": init_w(k3, num_hiddens, num_hiddens),
        # nn.Embedding default init ~ N(0, 1)
        "rel_k": jax.random.normal(k4, (2 * clipping_distance + 1, head_dim), jnp.float32),
        "rel_v": jax.random.normal(k5, (2 * clipping_distance + 1, head_dim), jnp.float32),
    }

    # self-attention inputs (canonical use of RPR attention)
    x = jax.random.normal(k6, (batch, seq, query_size), jnp.float32)
    valid_lens = jnp.array([3, 6], dtype=jnp.int32)

    out = multi_head_attention_rpr(params, x, x, x, valid_lens,
                                   num_heads=num_heads,
                                   clipping_distance=clipping_distance)
    out = jax.block_until_ready(out)

    ref = reference_mha_rpr(params, x, x, x, valid_lens,
                            num_heads=num_heads,
                            clipping_distance=clipping_distance)

    assert out.shape == (batch, seq, num_hiddens)
    # tolerance accommodates the approximate EUP reciprocal in the softmax
    assert jnp.allclose(out, ref, atol=2e-3, rtol=2e-3)

    print("KERNEL_OK")
</pallas_src>

<mosaic_0001>
module attributes {stable_mosaic.version = 11 : i64} {
  func.func @_matmul_kernel(%arg0: i32, %arg1: i32, %arg2: i32, %arg3: memref<16x32xf32, #tpu.memory_space<vmem>>, %arg4: memref<32x96xf32, #tpu.memory_space<vmem>>, %arg5: memref<16x96xf32, #tpu.memory_space<vmem>>, %arg6: memref<16x96xf32, #tpu.memory_space<vmem>>) attributes {dimension_semantics = [#tpu.dimension_semantics<parallel>, #tpu.dimension_semantics<parallel>, #tpu.dimension_semantics<arbitrary>], iteration_bounds = array<i64: 1, 1, 1>, scalar_prefetch = 0 : i64, scratch_operands = 1 : i64, tpu.core_type = #tpu.core_type<tc>, window_params = [{transform_indices = @transform_0, window_bounds = array<i64: 16, 32>}, {transform_indices = @transform_1, window_bounds = array<i64: 32, 96>}, {transform_indices = @transform_2, window_bounds = array<i64: 16, 96>}]} {
    %c0_i32 = arith.constant 0 : i32
    %0 = arith.cmpi eq, %arg2, %c0_i32 : i32
    %1 = arith.extui %0 : i1 to i32
    %c0_i32_0 = arith.constant 0 : i32
    %2 = arith.cmpi ne, %1, %c0_i32_0 : i32
    scf.if %2 {
      %cst_10 = arith.constant 0.000000e+00 : f32
      %12 = vector.broadcast %cst_10 : f32 to vector<16x96xf32>
      %c0_11 = arith.constant 0 : index
      %c0_12 = arith.constant 0 : index
      %13 = vector.load %arg6[%c0_11, %c0_12] : memref<16x96xf32, #tpu.memory_space<vmem>>, vector<16x96xf32>
      tpu.vector_store %arg6[%c0_11, %c0_12], %12 {strides = array<i32>} : memref<16x96xf32, #tpu.memory_space<vmem>>, vector<16x96xf32>,
    } else {
    }
    %c0 = arith.constant 0 : index
    %c0_1 = arith.constant 0 : index
    %3 = vector.load %arg6[%c0, %c0_1] : memref<16x96xf32, #tpu.memory_space<vmem>>, vector<16x96xf32>
    %c0_2 = arith.constant 0 : index
    %c0_3 = arith.constant 0 : index
    %4 = vector.load %arg3[%c0_2, %c0_3] : memref<16x32xf32, #tpu.memory_space<vmem>>, vector<16x32xf32>
    %c0_4 = arith.constant 0 : index
    %c0_5 = arith.constant 0 : index
    %5 = vector.load %arg4[%c0_4, %c0_5] : memref<32x96xf32, #tpu.memory_space<vmem>>, vector<32x96xf32>
    %cst = arith.constant dense<0.000000e+00> : vector<16x96xf32>
    %6 = tpu.matmul %4, %5, %cst {dimension_numbers = #tpu.dot_dimension_numbers<[1], [0], [0], [1], [0, 0, 1, 1], [], []>} : vector<16x32xf32>, vector<32x96xf32>, vector<16x96xf32> -> vector<16x96xf32>
    %7 = arith.addf %3, %6 : vector<16x96xf32>
    %c0_6 = arith.constant 0 : index
    %c0_7 = arith.constant 0 : index
    %8 = vector.load %arg6[%c0_6, %c0_7] : memref<16x96xf32, #tpu.memory_space<vmem>>, vector<16x96xf32>
    tpu.vector_store %arg6[%c0_6, %c0_7], %7 {strides = array<i32>} : memref<16x96xf32, #tpu.memory_space<vmem>>, vector<16x96xf32>,
    %c0_i32_8 = arith.constant 0 : i32
    %9 = arith.cmpi eq, %arg2, %c0_i32_8 : i32
    %10 = arith.extui %9 : i1 to i32
    %c0_i32_9 = arith.constant 0 : i32
    %11 = arith.cmpi ne, %10, %c0_i32_9 : i32
    scf.if %11 {
      %c0_10 = arith.constant 0 : index
      %c0_11 = arith.constant 0 : index
      %12 = vector.load %arg6[%c0_10, %c0_11] : memref<16x96xf32, #tpu.memory_space<vmem>>, vector<16x96xf32>
      %c0_12 = arith.constant 0 : index
      %c0_13 = arith.constant 0 : index
      %13 = vector.load %arg5[%c0_12, %c0_13] : memref<16x96xf32, #tpu.memory_space<vmem>>, vector<16x96xf32>
      tpu.vector_store %arg5[%c0_12, %c0_13], %12 {strides = array<i32>} : memref<16x96xf32, #tpu.memory_space<vmem>>, vector<16x96xf32>,
    } else {
    }
    return
  }
  func.func @transform_0(%arg0: i32, %arg1: i32, %arg2: i32) -> (i32, i32) {
    %c0_i32 = arith.constant 0 : i32
    return %arg0, %arg2 : i32, i32
  }
  func.func @transform_1(%arg0: i32, %arg1: i32, %arg2: i32) -> (i32, i32) {
    %c0_i32 = arith.constant 0 : i32
    return %arg2, %arg1 : i32, i32
  }
  func.func @transform_2(%arg0: i32, %arg1: i32, %arg2: i32) -> (i32, i32) {
    %c0_i32 = arith.constant 0 : i32
    return %arg0, %arg1 : i32, i32
  }
}

</mosaic_0001>

<bundles_post_ra>
// kernel: tpu_custom_call.1
= control target key start
LH: loop header
LB: loop body
LE: loop exit
PB: predicated region body
PF: predicated region fallthrough
CT: control target
= control target key end

     0   :  { %7 = vsyncpa [#allocation4], 0  ;;  %s305_s0 = inlined_call_operand.hbm [shape: f32[16,32], index: 0, kind: input, shape index: {}]   ;;  %s306_s1 = inlined_call_operand.hbm [shape: f32[32,96], index: 1, kind: input, shape index: {}]   ;;  %s307_s2 = inlined_call_operand.hbm [shape: f32[16,96], index: 2, kind: output, shape index: {}]  }
   0x1   :  { %8 = vsyncpa [#allocation7], 0 }
   0x2   :  { %9 = vsyncpa [#allocation5], 0  ;;  %s258_s9 = smov [#allocation3]  }
   0x3   :  { %s15_s10 = sshll.u32 %s258_s9, 4  ;;  %s16_s10 = int_to_ptr.vmem [resolvable:$true] %s15_s10 }
   0x4   :  { %s200_s11 = scalar_lea.vmem %s16_s10, 256  ;;  %p205_p1 = scmp.lt.s32.totalorder %s16_s10, %s16_s10 }
   0x5   :  { %p201_p0 = scmp.ne.s32.totalorder %s16_s10, %s200_s11  ;;  %p206_p2 = scmp.lt.s32.totalorder %s200_s11, %s200_s11 }
   0x7   :  { %p207_p3 = por %p206_p2, %p205_p1 }
   0x9   :  { %p208_p4 = pnand %p207_p3, %p201_p0 }
   0xb   :  { %211 = shalt.err (!%p208_p4)
}
   0xc   :  { %s259_s12 = smov 128   ;;  %s260_s13 = smov 8  }
   0xd   :  { %21 = dma.hbm_to_vmem [thread:$0]  %s305_s0, 256, %s16_s10, [#allocation4], %s259_s12, %s259_s12, %s260_s13  }
   0xe   :  { %s261_s16 = smov [#allocation6]  }
   0xf   :  { %s27_s17 = sshll.u32 %s261_s16, 4  ;;  %s28_s17 = int_to_ptr.vmem [resolvable:$true] %s27_s17 }
  0x10   :  { %s220_s18 = scalar_lea.vmem %s28_s17, 512  ;;  %p225_p6 = scmp.lt.s32.totalorder %s28_s17, %s28_s17 }
  0x11   :  { %p221_p5 = scmp.ne.s32.totalorder %s28_s17, %s220_s18  ;;  %p226_p7 = scmp.lt.s32.totalorder %s220_s18, %s220_s18 }
  0x13   :  { %p227_p8 = por %p226_p7, %p225_p6 }
  0x15   :  { %p228_p9 = pnand %p227_p8, %p221_p5 }
  0x17   :  { %231 = shalt.err (!%p228_p9)
}
  0x18   :  { %33 = dma.hbm_to_vmem [thread:$0]  %s306_s1, 512, %s28_s17, [#allocation7], %s259_s12, %s259_s12, %s260_s13  }
  0x19   :  { %252 = dma.done.wait [#allocation4], 256  }
  0x1a   :  { %253 = vsyncadd [#allocation4], 4294967040 }
  0x1b   :  { %254 = dma.done.wait [#allocation7], 512  }
  0x1c   :  { %255 = vsyncadd [#allocation7], 4294966784  ;;  %vm44_vm0 = vcmask 785408   ;;  %v262_v0 = vmov 0.0   ;;  %vm55_vm1 = vcmask 261120   ;;  %v54_v1 = vld [vmem:[#allocation6 + $0x18] sm:$0xff] }
  0x1d   :  { %46 = vst.msk [vmem:[#allocation2 + $0x8] sm:$0xff] %vm44_vm0, %v262_v0  ;;  %45 = vst.msk [vmem:[#allocation2] sm:$0xff] %vm44_vm0, %v262_v0  ;;  %v53_v2 = vld [vmem:[#allocation6 + $0x10] sm:$0xff]  ;;  %175 = vmatprep.subr.mxu0 %v54_v1  ;;  %v52_v4 = vld [vmem:[#allocation6 + $0x8] sm:$0xff]  ;;  %s263_s0 = smov [#allocation8]  }
  0x1e   :  { %v49_v3 = vld [vmem:[#allocation3] sm:$0xff]  ;;  %176 = vmatpush3.msra.mxu0 %v54_v1  ;;  %v51_v5 = vld [vmem:[#allocation6] sm:$0xff]  ;;  %v50_v6 = vld [vmem:[#allocation3 + $0x8] sm:$0xff]  ;;  %s154_s1 = sshll.u32 %s263_s0, 4  ;;  %s155_s1 = int_to_ptr.vmem [resolvable:$true] %s154_s1 }
  0x1f   :  { %183 = vmatprep.mubr.msk.f32.mxu0 %vm55_vm1, %v49_v3  ;;  %177 = vmatprep.subr.mxu0 %v53_v2  ;;  %s232_s21 = scalar_lea.vmem %s155_s1, 256  ;;  %p237_p11 = scmp.lt.s32.totalorder %s155_s1, %s155_s1 }
  0x20   :  { %178 = vmatpush3.msra.mxu0 %v53_v2  ;;  %p233_p10 = scmp.ne.s32.totalorder %s155_s1, %s232_s21  ;;  %p238_p12 = scmp.lt.s32.totalorder %s232_s21, %s232_s21 }
  0x21   :  { %179 = vmatprep.subr.mxu0 %v52_v4 }
  0x22   :  { %180 = vmatpush3.msra.mxu0 %v52_v4  ;;  %p239_p13 = por %p238_p12, %p237_p11 }
  0x23   :  { %181 = vmatprep.subr.mxu0 %v51_v5 }
  0x24   :  { %182 = vmatpush3.msra.mxu0 %v51_v5  ;;  %v48_v7 = vld [vmem:[#allocation2 + $0x8] sm:$0xff]  ;;  %v47_v9 = vld [vmem:[#allocation2] sm:$0xff]  ;;  %p240_p0 = pnand %p239_p13, %p233_p10 }
  0x25   :  { %184 = vmatmul.mubr.msk.f32.vlgmr.msra.gmra.mxu0 %vm55_vm1, %v50_v6 }
  0xe5   :  { %v185_v8 = vpop.f32.mrf.mxu0 }
  0xe6   :  { %v138_v10 = vadd.f32 %v185_v8, %v48_v7 }
  0xe7   :  { %v128_v11 = vpop.f32.mrf.mxu0 }
  0xe8   :  { %141 = vst.msk [vmem:[#allocation2 + $0x8] sm:$0xff] %vm44_vm0, %v138_v10  ;;  %v137_v12 = vadd.f32 %v128_v11, %v47_v9 }
  0xea   :  { %140 = vst.msk [vmem:[#allocation2] sm:$0xff] %vm44_vm0, %v137_v12 }
  0xef   :  { %v146_v13 = vld [vmem:[#allocation2 + $0x8] sm:$0xff] }
  0xf0   :  { %148 = vst.msk [vmem:[#allocation8 + $0x8] sm:$0xff] %vm44_vm0, %v146_v13 }
  0xf1   :  { %v145_v14 = vld [vmem:[#allocation2] sm:$0xff] }
  0xf2   :  { %147 = vst.msk [vmem:[#allocation8] sm:$0xff] %vm44_vm0, %v145_v14 }
  0xf3   :  { %243 = shalt.err (!%p240_p0)
}
  0xf4   :  { %160 = dma.vmem_to_hbm [thread:$0]  %s155_s1, 256, %s307_s2, [#allocation5], %s259_s12, %s259_s12, %s260_s13  }
  0xf5   :  { %256 = dma.done.wait [#allocation5], 256  }
  0xf6   :  { %257 = vsyncadd [#allocation5], 4294967040 }
  0xf7   :  { %164 = vsyncpa [#allocation4], 1 }
  0xf8   :  { %165 = vsyncpa [#allocation7], 1 }
  0xf9   :  { %166 = vsyncpa [#allocation5], 1 }

</bundles_post_ra>
